<compile_context>
chip_gen: v7x
topology: tpu7x:2x2x1
jax: 0.10.0
libtpu: 0.0.40
codegen_flags: <defaults>
</compile_context>

<pallas_src>
import jax
import jax.numpy as jnp
from jax import lax
from jax.experimental import pallas as pl
from jax.experimental.pallas import tpu as pltpu


def _relu(x):
    return jnp.maximum(x, 0.0)


def egcl_at_x_kernel(
    h_ref, coord_ref,
    wq1_ref, bq1_ref, wq2_ref, bq2_ref,
    wk1_ref, bk1_ref, wk2_ref, bk2_ref,
    wv1_ref, bv1_ref, wv2_ref, bv2_ref,
    wc1_ref, bc1_ref, wc2_ref,
    h_out_ref, coord_out_ref,
):
    f32 = jnp.float32
    h = h_ref[...]                       # [S, H]  (one batch element)
    H = h.shape[1]
    C = coord_ref.shape[2]               # coord_ref: [3, S, C] (xyz-major)

    def mlp2(x, w1, b1, w2, b2):
        y = _relu(jnp.dot(x, w1[...], preferred_element_type=f32) + b1[...])
        return _relu(jnp.dot(y, w2[...], preferred_element_type=f32) + b2[...])

    q = mlp2(h, wq1_ref, bq1_ref, wq2_ref, bq2_ref)    # [S, H]
    k = mlp2(h, wk1_ref, bk1_ref, wk2_ref, bk2_ref)    # [S, H]
    v = mlp2(h, wv1_ref, bv1_ref, wv2_ref, bv2_ref)    # [S, H]

    # scores[i, j] = q_i . k_j  (contract hidden dim; softmax over j)
    scores = lax.dot_general(q, k, (((1,), (1,)), ((), ())),
                             preferred_element_type=f32)          # [S, S]
    m = jnp.max(scores, axis=-1, keepdims=True)
    e = jnp.exp(scores - m)
    alpha = e / jnp.sum(e, axis=-1, keepdims=True)                # [S, S]

    # coord_mlp(v): Linear(H,H) -> ReLU -> Linear(H,C, no bias)
    cm = jnp.dot(
        _relu(jnp.dot(v, wc1_ref[...], preferred_element_type=f32) + bc1_ref[...]),
        wc2_ref[...], preferred_element_type=f32)                 # [S, C]

    c0 = coord_ref[0, :, :]                                       # [S, C]  x
    c1 = coord_ref[1, :, :]                                       # [S, C]  y
    c2 = coord_ref[2, :, :]                                       # [S, C]  z

    # One fused, lane-dense aggregation matmul on the MXU.
    rhs = jnp.concatenate([v, cm, cm * c0, cm * c1, cm * c2], axis=-1)  # [S, H+4C]
    agg = jnp.dot(alpha, rhs, preferred_element_type=f32)               # [S, H+4C]

    # recurrent=True residual on h.
    h_out_ref[...] = h + agg[:, :H]

    # x_agg_t = coord_t * (alpha @ cm) - alpha @ (cm * coord_t)
    s1 = agg[:, H:H + C]
    coord_out_ref[0, :, :] = c0 + c0 * s1 - agg[:, H + C:H + 2 * C]
    coord_out_ref[1, :, :] = c1 + c1 * s1 - agg[:, H + 2 * C:H + 3 * C]
    coord_out_ref[2, :, :] = c2 + c2 * s1 - agg[:, H + 3 * C:H + 4 * C]


def e_gcl_at_x_forward(h, coord, params):
    """h: [S, B, H] f32, coord: [S, B, C, 3] f32. Returns (h_out, coord_out)."""
    S, B, H = h.shape
    C = coord.shape[2]

    h_b = jnp.transpose(h, (1, 0, 2)).astype(jnp.float32)             # [B, S, H]
    coord_b = jnp.transpose(coord, (1, 3, 0, 2)).astype(jnp.float32)  # [B, 3, S, C]

    weight_names = ["wq1", "bq1", "wq2", "bq2",
                    "wk1", "bk1", "wk2", "bk2",
                    "wv1", "bv1", "wv2", "bv2",
                    "wc1", "bc1", "wc2"]
    weights = [params[n] for n in weight_names]

    def rep_spec(x):
        nd = x.ndim
        return pl.BlockSpec(x.shape, lambda b, _nd=nd: (0,) * _nd)

    in_specs = (
        [pl.BlockSpec((None, S, H), lambda b: (b, 0, 0)),
         pl.BlockSpec((None, 3, S, C), lambda b: (b, 0, 0, 0))]
        + [rep_spec(w) for w in weights]
    )
    out_specs = (
        pl.BlockSpec((None, S, H), lambda b: (b, 0, 0)),
        pl.BlockSpec((None, 3, S, C), lambda b: (b, 0, 0, 0)),
    )
    out_shape = (
        jax.ShapeDtypeStruct((B, S, H), jnp.float32),
        jax.ShapeDtypeStruct((B, 3, S, C), jnp.float32),
    )

    flops = B * (6 * 2 * S * H * H        # q/k/v MLPs
                 + 2 * S * S * H          # q @ k^T
                 + 2 * S * H * H + 2 * S * H * C   # coord_mlp
                 + 2 * S * S * (H + 4 * C))        # fused aggregation
    bytes_accessed = (sum(int(x.size) for x in [h_b, coord_b] + weights)
                      + B * S * H + B * 3 * S * C) * 4

    h_out, coord_out = pl.pallas_call(
        egcl_at_x_kernel,
        grid=(B,),
        in_specs=in_specs,
        out_specs=out_specs,
        out_shape=out_shape,
        compiler_params=pltpu.CompilerParams(
            dimension_semantics=("parallel",),
            vmem_limit_bytes=32 * 1024 * 1024),
        cost_estimate=pl.CostEstimate(
            flops=int(flops),
            transcendentals=int(B * S * S),
            bytes_accessed=int(bytes_accessed)),
    )(h_b, coord_b, *weights)

    h_out = jnp.transpose(h_out, (1, 0, 2))              # [S, B, H]
    coord_out = jnp.transpose(coord_out, (2, 0, 3, 1))   # [S, B, C, 3]
    return h_out, coord_out


def init_params(key, hidden_nf, coord_channels=4):
    """PyTorch-Linear-style uniform init; final coord layer xavier(gain=0.001)."""
    ks = jax.random.split(key, 16)

    def lin_w(k, fan_in, fan_out):
        bound = 1.0 / float(jnp.sqrt(fan_in))
        return jax.random.uniform(k, (fan_in, fan_out), jnp.float32, -bound, bound)

    def lin_b(k, fan_in, fan_out):
        bound = 1.0 / float(jnp.sqrt(fan_in))
        return jax.random.uniform(k, (1, fan_out), jnp.float32, -bound, bound)

    H = hidden_nf
    xav = 0.001 * float(jnp.sqrt(6.0 / (H + coord_channels)))
    return {
        "wq1": lin_w(ks[0], H, H), "bq1": lin_b(ks[1], H, H),
        "wq2": lin_w(ks[2], H, H), "bq2": lin_b(ks[3], H, H),
        "wk1": lin_w(ks[4], H, H), "bk1": lin_b(ks[5], H, H),
        "wk2": lin_w(ks[6], H, H), "bk2": lin_b(ks[7], H, H),
        "wv1": lin_w(ks[8], H, H), "bv1": lin_b(ks[9], H, H),
        "wv2": lin_w(ks[10], H, H), "bv2": lin_b(ks[11], H, H),
        "wc1": lin_w(ks[12], H, H), "bc1": lin_b(ks[13], H, H),
        "wc2": jax.random.uniform(ks[14], (H, coord_channels), jnp.float32,
                                  -xav, xav),
    }


def ref_forward(h, coord, params):
    """Pure-JAX mirror of the PyTorch E_GCL_AT_X.forward (default flags)."""
    p = params
    relu = lambda x: jnp.maximum(x, 0.0)

    def mlp2(x, w1, b1, w2, b2):
        return relu(relu(x @ w1 + b1) @ w2 + b2)

    q = mlp2(h, p["wq1"], p["bq1"], p["wq2"], p["bq2"])[:, None]   # [S,1,B,H]
    k = mlp2(h, p["wk1"], p["bk1"], p["wk2"], p["bk2"])[None]      # [1,S,B,H]
    v = mlp2(h, p["wv1"], p["bv1"], p["wv2"], p["bv2"])[None]      # [1,S,B,H]

    scores = jnp.sum(q * k, axis=-1)                               # [S,S,B]
    alpha = jax.nn.softmax(scores, axis=1)                         # softmax over j
    h_agg = jnp.sum(alpha[..., None] * v, axis=1)                  # [S,B,H]

    cm = relu(v @ p["wc1"] + p["bc1"]) @ p["wc2"]                  # [1,S,B,C]
    coord_diff = coord[:, None, ...] - coord[None, ...]            # [S,S,B,C,3]
    x_agg = jnp.sum(coord_diff * alpha[..., None, None] * cm[..., None],
                    axis=1)                                        # [S,B,C,3]
    return h + h_agg, coord + x_agg


if __name__ == "__main__":
    S, B, H, C = 8, 2, 32, 4   # seq, batch, hidden_nf, coord channels

    key = jax.random.PRNGKey(0)
    k_h, k_c, k_p = jax.random.split(key, 3)
    h = jax.random.normal(k_h, (S, B, H), jnp.float32)
    coord = jax.random.normal(k_c, (S, B, C, 3), jnp.float32)
    params = init_params(k_p, H, C)

    h_out, coord_out = e_gcl_at_x_forward(h, coord, params)
    jax.block_until_ready((h_out, coord_out))

    h_expect, coord_expect = ref_forward(h, coord, params)
    assert h_out.shape == h_expect.shape and coord_out.shape == coord_expect.shape
    assert jnp.allclose(h_out, h_expect, rtol=1e-4, atol=1e-4), "h mismatch"
    assert jnp.allclose(coord_out, coord_expect, rtol=1e-4, atol=1e-4), "coord mismatch"

    print("KERNEL_OK")
</pallas_src>

<mosaic_0001>
module attributes {stable_mosaic.version = 11 : i64} {
  func.func @egcl_at_x_kernel(%arg0: i32, %arg1: memref<1x8x32xf32, #tpu.memory_space<vmem>>, %arg2: memref<1x3x8x4xf32, #tpu.memory_space<vmem>>, %arg3: memref<32x32xf32, #tpu.memory_space<vmem>>, %arg4: memref<1x32xf32, #tpu.memory_space<vmem>>, %arg5: memref<32x32xf32, #tpu.memory_space<vmem>>, %arg6: memref<1x32xf32, #tpu.memory_space<vmem>>, %arg7: memref<32x32xf32, #tpu.memory_space<vmem>>, %arg8: memref<1x32xf32, #tpu.memory_space<vmem>>, %arg9: memref<32x32xf32, #tpu.memory_space<vmem>>, %arg10: memref<1x32xf32, #tpu.memory_space<vmem>>, %arg11: memref<32x32xf32, #tpu.memory_space<vmem>>, %arg12: memref<1x32xf32, #tpu.memory_space<vmem>>, %arg13: memref<32x32xf32, #tpu.memory_space<vmem>>, %arg14: memref<1x32xf32, #tpu.memory_space<vmem>>, %arg15: memref<32x32xf32, #tpu.memory_space<vmem>>, %arg16: memref<1x32xf32, #tpu.memory_space<vmem>>, %arg17: memref<32x4xf32, #tpu.memory_space<vmem>>, %arg18: memref<1x8x32xf32, #tpu.memory_space<vmem>>, %arg19: memref<1x3x8x4xf32, #tpu.memory_space<vmem>>) attributes {dimension_semantics = [#tpu.dimension_semantics<parallel>], iteration_bounds = array<i64: 2>, scalar_prefetch = 0 : i64, scratch_operands = 0 : i64, tpu.core_type = #tpu.core_type<tc>, window_params = [{transform_indices = @transform_0, window_bounds = array<i64: 1, 8, 32>}, {transform_indices = @transform_1, window_bounds = array<i64: 1, 3, 8, 4>}, {pipeline_mode = #tpu.pipeline_mode<synchronous>, transform_indices = @transform_2, window_bounds = array<i64: 32, 32>}, {pipeline_mode = #tpu.pipeline_mode<synchronous>, transform_indices = @transform_3, window_bounds = array<i64: 1, 32>}, {pipeline_mode = #tpu.pipeline_mode<synchronous>, transform_indices = @transform_4, window_bounds = array<i64: 32, 32>}, {pipeline_mode = #tpu.pipeline_mode<synchronous>, transform_indices = @transform_5, window_bounds = array<i64: 1, 32>}, {pipeline_mode = #tpu.pipeline_mode<synchronous>, transform_indices = @transform_6, window_bounds = array<i64: 32, 32>}, {pipeline_mode = #tpu.pipeline_mode<synchronous>, transform_indices = @transform_7, window_bounds = array<i64: 1, 32>}, {pipeline_mode = #tpu.pipeline_mode<synchronous>, transform_indices = @transform_8, window_bounds = array<i64: 32, 32>}, {pipeline_mode = #tpu.pipeline_mode<synchronous>, transform_indices = @transform_9, window_bounds = array<i64: 1, 32>}, {pipeline_mode = #tpu.pipeline_mode<synchronous>, transform_indices = @transform_10, window_bounds = array<i64: 32, 32>}, {pipeline_mode = #tpu.pipeline_mode<synchronous>, transform_indices = @transform_11, window_bounds = array<i64: 1, 32>}, {pipeline_mode = #tpu.pipeline_mode<synchronous>, transform_indices = @transform_12, window_bounds = array<i64: 32, 32>}, {pipeline_mode = #tpu.pipeline_mode<synchronous>, transform_indices = @transform_13, window_bounds = array<i64: 1, 32>}, {pipeline_mode = #tpu.pipeline_mode<synchronous>, transform_indices = @transform_14, window_bounds = array<i64: 32, 32>}, {pipeline_mode = #tpu.pipeline_mode<synchronous>, transform_indices = @transform_15, window_bounds = array<i64: 1, 32>}, {pipeline_mode = #tpu.pipeline_mode<synchronous>, transform_indices = @transform_16, window_bounds = array<i64: 32, 4>}, {transform_indices = @transform_17, window_bounds = array<i64: 1, 8, 32>}, {transform_indices = @transform_18, window_bounds = array<i64: 1, 3, 8, 4>}]} {
    %c0 = arith.constant 0 : index
    %c0_0 = arith.constant 0 : index
    %c0_1 = arith.constant 0 : index
    %0 = vector.load %arg1[%c0, %c0_0, %c0_1] : memref<1x8x32xf32, #tpu.memory_space<vmem>>, vector<1x8x32xf32>
    %1 = vector.shape_cast %0 : vector<1x8x32xf32> to vector<8x32xf32>
    %c0_2 = arith.constant 0 : index
    %c0_3 = arith.constant 0 : index
    %2 = vector.load %arg3[%c0_2, %c0_3] : memref<32x32xf32, #tpu.memory_space<vmem>>, vector<32x32xf32>
    %cst = arith.constant dense<0.000000e+00> : vector<8x32xf32>
    %3 = tpu.matmul %1, %2, %cst {dimension_numbers = #tpu.dot_dimension_numbers<[1], [0], [0], [1], [0, 0, 1, 1], [], []>} : vector<8x32xf32>, vector<32x32xf32>, vector<8x32xf32> -> vector<8x32xf32>
    %c0_4 = arith.constant 0 : index
    %c0_5 = arith.constant 0 : index
    %4 = vector.load %arg4[%c0_4, %c0_5] : memref<1x32xf32, #tpu.memory_space<vmem>>, vector<1x32xf32>
    %5 = vector.broadcast %4 : vector<1x32xf32> to vector<8x32xf32>
    %6 = arith.addf %3, %5 : vector<8x32xf32>
    %cst_6 = arith.constant 0.000000e+00 : f32
    %7 = vector.broadcast %cst_6 : f32 to vector<8x32xf32>
    %8 = arith.maximumf %6, %7 : vector<8x32xf32>
    %c0_7 = arith.constant 0 : index
    %c0_8 = arith.constant 0 : index
    %9 = vector.load %arg5[%c0_7, %c0_8] : memref<32x32xf32, #tpu.memory_space<vmem>>, vector<32x32xf32>
    %cst_9 = arith.constant dense<0.000000e+00> : vector<8x32xf32>
    %10 = tpu.matmul %8, %9, %cst_9 {dimension_numbers = #tpu.dot_dimension_numbers<[1], [0], [0], [1], [0, 0, 1, 1], [], []>} : vector<8x32xf32>, vector<32x32xf32>, vector<8x32xf32> -> vector<8x32xf32>
    %c0_10 = arith.constant 0 : index
    %c0_11 = arith.constant 0 : index
    %11 = vector.load %arg6[%c0_10, %c0_11] : memref<1x32xf32, #tpu.memory_space<vmem>>, vector<1x32xf32>
    %12 = vector.broadcast %11 : vector<1x32xf32> to vector<8x32xf32>
    %13 = arith.addf %10, %12 : vector<8x32xf32>
    %cst_12 = arith.constant 0.000000e+00 : f32
    %14 = vector.broadcast %cst_12 : f32 to vector<8x32xf32>
    %15 = arith.maximumf %13, %14 : vector<8x32xf32>
    %c0_13 = arith.constant 0 : index
    %c0_14 = arith.constant 0 : index
    %16 = vector.load %arg7[%c0_13, %c0_14] : memref<32x32xf32, #tpu.memory_space<vmem>>, vector<32x32xf32>
    %cst_15 = arith.constant dense<0.000000e+00> : vector<8x32xf32>
    %17 = tpu.matmul %1, %16, %cst_15 {dimension_numbers = #tpu.dot_dimension_numbers<[1], [0], [0], [1], [0, 0, 1, 1], [], []>} : vector<8x32xf32>, vector<32x32xf32>, vector<8x32xf32> -> vector<8x32xf32>
    %c0_16 = arith.constant 0 : index
    %c0_17 = arith.constant 0 : index
    %18 = vector.load %arg8[%c0_16, %c0_17] : memref<1x32xf32, #tpu.memory_space<vmem>>, vector<1x32xf32>
    %19 = vector.broadcast %18 : vector<1x32xf32> to vector<8x32xf32>
    %20 = arith.addf %17, %19 : vector<8x32xf32>
    %cst_18 = arith.constant 0.000000e+00 : f32
    %21 = vector.broadcast %cst_18 : f32 to vector<8x32xf32>
    %22 = arith.maximumf %20, %21 : vector<8x32xf32>
    %c0_19 = arith.constant 0 : index
    %c0_20 = arith.constant 0 : index
    %23 = vector.load %arg9[%c0_19, %c0_20] : memref<32x32xf32, #tpu.memory_space<vmem>>, vector<32x32xf32>
    %cst_21 = arith.constant dense<0.000000e+00> : vector<8x32xf32>
    %24 = tpu.matmul %22, %23, %cst_21 {dimension_numbers = #tpu.dot_dimension_numbers<[1], [0], [0], [1], [0, 0, 1, 1], [], []>} : vector<8x32xf32>, vector<32x32xf32>, vector<8x32xf32> -> vector<8x32xf32>
    %c0_22 = arith.constant 0 : index
    %c0_23 = arith.constant 0 : index
    %25 = vector.load %arg10[%c0_22, %c0_23] : memref<1x32xf32, #tpu.memory_space<vmem>>, vector<1x32xf32>
    %26 = vector.broadcast %25 : vector<1x32xf32> to vector<8x32xf32>
    %27 = arith.addf %24, %26 : vector<8x32xf32>
    %cst_24 = arith.constant 0.000000e+00 : f32
    %28 = vector.broadcast %cst_24 : f32 to vector<8x32xf32>
    %29 = arith.maximumf %27, %28 : vector<8x32xf32>
    %c0_25 = arith.constant 0 : index
    %c0_26 = arith.constant 0 : index
    %30 = vector.load %arg11[%c0_25, %c0_26] : memref<32x32xf32, #tpu.memory_space<vmem>>, vector<32x32xf32>
    %cst_27 = arith.constant dense<0.000000e+00> : vector<8x32xf32>
    %31 = tpu.matmul %1, %30, %cst_27 {dimension_numbers = #tpu.dot_dimension_numbers<[1], [0], [0], [1], [0, 0, 1, 1], [], []>} : vector<8x32xf32>, vector<32x32xf32>, vector<8x32xf32> -> vector<8x32xf32>
    %c0_28 = arith.constant 0 : index
    %c0_29 = arith.constant 0 : index
    %32 = vector.load %arg12[%c0_28, %c0_29] : memref<1x32xf32, #tpu.memory_space<vmem>>, vector<1x32xf32>
    %33 = vector.broadcast %32 : vector<1x32xf32> to vector<8x32xf32>
    %34 = arith.addf %31, %33 : vector<8x32xf32>
    %cst_30 = arith.constant 0.000000e+00 : f32
    %35 = vector.broadcast %cst_30 : f32 to vector<8x32xf32>
    %36 = arith.maximumf %34, %35 : vector<8x32xf32>
    %c0_31 = arith.constant 0 : index
    %c0_32 = arith.constant 0 : index
    %37 = vector.load %arg13[%c0_31, %c0_32] : memref<32x32xf32, #tpu.memory_space<vmem>>, vector<32x32xf32>
    %cst_33 = arith.constant dense<0.000000e+00> : vector<8x32xf32>
    %38 = tpu.matmul %36, %37, %cst_33 {dimension_numbers = #tpu.dot_dimension_numbers<[1], [0], [0], [1], [0, 0, 1, 1], [], []>} : vector<8x32xf32>, vector<32x32xf32>, vector<8x32xf32> -> vector<8x32xf32>
    %c0_34 = arith.constant 0 : index
    %c0_35 = arith.constant 0 : index
    %39 = vector.load %arg14[%c0_34, %c0_35] : memref<1x32xf32, #tpu.memory_space<vmem>>, vector<1x32xf32>
    %40 = vector.broadcast %39 : vector<1x32xf32> to vector<8x32xf32>
    %41 = arith.addf %38, %40 : vector<8x32xf32>
    %cst_36 = arith.constant 0.000000e+00 : f32
    %42 = vector.broadcast %cst_36 : f32 to vector<8x32xf32>
    %43 = arith.maximumf %41, %42 : vector<8x32xf32>
    %cst_37 = arith.constant dense<0.000000e+00> : vector<8x8xf32>
    %44 = tpu.matmul %15, %29, %cst_37 {dimension_numbers = #tpu.dot_dimension_numbers<[1], [1], [0], [0], [0, 0, 1, 0], [], []>} : vector<8x32xf32>, vector<8x32xf32>, vector<8x8xf32> -> vector<8x8xf32>
    %cst_38 = arith.constant dense<0xFF800000> : vector<8xf32>
    %45 = vector.multi_reduction <maximumf>, %44, %cst_38 [1] : vector<8x8xf32> to vector<8xf32>
    %46 = vector.shape_cast %45 : vector<8xf32> to vector<8x1xf32>
    %47 = vector.broadcast %46 : vector<8x1xf32> to vector<8x8xf32>
    %48 = arith.subf %44, %47 : vector<8x8xf32>
    %49 = math.exp %48 : vector<8x8xf32>
    %cst_39 = arith.constant dense<0.000000e+00> : vector<8xf32>
    %50 = vector.multi_reduction <add>, %49, %cst_39 [1] : vector<8x8xf32> to vector<8xf32>
    %51 = vector.shape_cast %50 : vector<8xf32> to vector<8x1xf32>
    %52 = vector.broadcast %51 : vector<8x1xf32> to vector<8x8xf32>
    %53 = arith.divf %49, %52 : vector<8x8xf32>
    %c0_40 = arith.constant 0 : index
    %c0_41 = arith.constant 0 : index
    %54 = vector.load %arg15[%c0_40, %c0_41] : memref<32x32xf32, #tpu.memory_space<vmem>>, vector<32x32xf32>
    %cst_42 = arith.constant dense<0.000000e+00> : vector<8x32xf32>
    %55 = tpu.matmul %43, %54, %cst_42 {dimension_numbers = #tpu.dot_dimension_numbers<[1], [0], [0], [1], [0, 0, 1, 1], [], []>} : vector<8x32xf32>, vector<32x32xf32>, vector<8x32xf32> -> vector<8x32xf32>
    %c0_43 = arith.constant 0 : index
    %c0_44 = arith.constant 0 : index
    %56 = vector.load %arg16[%c0_43, %c0_44] : memref<1x32xf32, #tpu.memory_space<vmem>>, vector<1x32xf32>
    %57 = vector.broadcast %56 : vector<1x32xf32> to vector<8x32xf32>
    %58 = arith.addf %55, %57 : vector<8x32xf32>
    %cst_45 = arith.constant 0.000000e+00 : f32
    %59 = vector.broadcast %cst_45 : f32 to vector<8x32xf32>
    %60 = arith.maximumf %58, %59 : vector<8x32xf32>
    %c0_46 = arith.constant 0 : index
    %c0_47 = arith.constant 0 : index
    %61 = vector.load %arg17[%c0_46, %c0_47] : memref<32x4xf32, #tpu.memory_space<vmem>>, vector<32x4xf32>
    %cst_48 = arith.constant dense<0.000000e+00> : vector<8x4xf32>
    %62 = tpu.matmul %60, %61, %cst_48 {dimension_numbers = #tpu.dot_dimension_numbers<[1], [0], [0], [1], [0, 0, 1, 1], [], []>} : vector<8x32xf32>, vector<32x4xf32>, vector<8x4xf32> -> vector<8x4xf32>
    %c0_49 = arith.constant 0 : index
    %c0_50 = arith.constant 0 : index
    %c0_51 = arith.constant 0 : index
    %c0_52 = arith.constant 0 : index
    %63 = vector.load %arg2[%c0_49, %c0_50, %c0_51, %c0_52] : memref<1x3x8x4xf32, #tpu.memory_space<vmem>>, vector<1x1x8x4xf32>
    %64 = vector.shape_cast %63 : vector<1x1x8x4xf32> to vector<8x4xf32>
    %c0_53 = arith.constant 0 : index
    %c1 = arith.constant 1 : index
    %c0_54 = arith.constant 0 : index
    %c0_55 = arith.constant 0 : index
    %65 = vector.load %arg2[%c0_53, %c1, %c0_54, %c0_55] : memref<1x3x8x4xf32, #tpu.memory_space<vmem>>, vector<1x1x8x4xf32>
    %66 = vector.shape_cast %65 : vector<1x1x8x4xf32> to vector<8x4xf32>
    %c0_56 = arith.constant 0 : index
    %c2 = arith.constant 2 : index
    %c0_57 = arith.constant 0 : index
    %c0_58 = arith.constant 0 : index
    %67 = vector.load %arg2[%c0_56, %c2, %c0_57, %c0_58] : memref<1x3x8x4xf32, #tpu.memory_space<vmem>>, vector<1x1x8x4xf32>
    %68 = vector.shape_cast %67 : vector<1x1x8x4xf32> to vector<8x4xf32>
    %69 = arith.mulf %62, %64 : vector<8x4xf32>
    %70 = arith.mulf %62, %66 : vector<8x4xf32>
    %71 = arith.mulf %62, %68 : vector<8x4xf32>
    %72 = tpu.concatenate %43, %62, %69, %70, %71 in 1 : vector<8x32xf32>, vector<8x4xf32>, vector<8x4xf32>, vector<8x4xf32>, vector<8x4xf32> -> vector<8x48xf32>
    %cst_59 = arith.constant dense<0.000000e+00> : vector<8x48xf32>
    %73 = tpu.matmul %53, %72, %cst_59 {dimension_numbers = #tpu.dot_dimension_numbers<[1], [0], [0], [1], [0, 0, 1, 1], [], []>} : vector<8x8xf32>, vector<8x48xf32>, vector<8x48xf32> -> vector<8x48xf32>
    %74 = vector.extract_strided_slice %73 {offsets = [0, 0], sizes = [8, 32], strides = [1, 1]} : vector<8x48xf32> to vector<8x32xf32>
    %75 = arith.addf %1, %74 : vector<8x32xf32>
    %c0_60 = arith.constant 0 : index
    %c0_61 = arith.constant 0 : index
    %c0_62 = arith.constant 0 : index
    %76 = vector.load %arg18[%c0_60, %c0_61, %c0_62] : memref<1x8x32xf32, #tpu.memory_space<vmem>>, vector<1x8x32xf32>
    %77 = vector.shape_cast %76 : vector<1x8x32xf32> to vector<8x32xf32>
    %78 = vector.shape_cast %75 : vector<8x32xf32> to vector<1x8x32xf32>
    tpu.vector_store %arg18[%c0_60, %c0_61, %c0_62], %78 {strides = array<i32>} : memref<1x8x32xf32, #tpu.memory_space<vmem>>, vector<1x8x32xf32>,
    %79 = vector.extract_strided_slice %73 {offsets = [0, 32], sizes = [8, 4], strides = [1, 1]} : vector<8x48xf32> to vector<8x4xf32>
    %80 = arith.mulf %64, %79 : vector<8x4xf32>
    %81 = arith.addf %64, %80 : vector<8x4xf32>
    %82 = vector.extract_strided_slice %73 {offsets = [0, 36], sizes = [8, 4], strides = [1, 1]} : vector<8x48xf32> to vector<8x4xf32>
    %83 = arith.subf %81, %82 : vector<8x4xf32>
    %c0_63 = arith.constant 0 : index
    %c0_64 = arith.constant 0 : index
    %c0_65 = arith.constant 0 : index
    %c0_66 = arith.constant 0 : index
    %84 = vector.load %arg19[%c0_63, %c0_64, %c0_65, %c0_66] : memref<1x3x8x4xf32, #tpu.memory_space<vmem>>, vector<1x1x8x4xf32>
    %85 = vector.shape_cast %84 : vector<1x1x8x4xf32> to vector<8x4xf32>
    %86 = vector.shape_cast %83 : vector<8x4xf32> to vector<1x1x8x4xf32>
    tpu.vector_store %arg19[%c0_63, %c0_64, %c0_65, %c0_66], %86 {strides = array<i32>} : memref<1x3x8x4xf32, #tpu.memory_space<vmem>>, vector<1x1x8x4xf32>,
    %87 = arith.mulf %66, %79 : vector<8x4xf32>
    %88 = arith.addf %66, %87 : vector<8x4xf32>
    %89 = vector.extract_strided_slice %73 {offsets = [0, 40], sizes = [8, 4], strides = [1, 1]} : vector<8x48xf32> to vector<8x4xf32>
    %90 = arith.subf %88, %89 : vector<8x4xf32>
    %c0_67 = arith.constant 0 : index
    %c1_68 = arith.constant 1 : index
    %c0_69 = arith.constant 0 : index
    %c0_70 = arith.constant 0 : index
    %91 = vector.load %arg19[%c0_67, %c1_68, %c0_69, %c0_70] : memref<1x3x8x4xf32, #tpu.memory_space<vmem>>, vector<1x1x8x4xf32>
    %92 = vector.shape_cast %91 : vector<1x1x8x4xf32> to vector<8x4xf32>
    %93 = vector.shape_cast %90 : vector<8x4xf32> to vector<1x1x8x4xf32>
    tpu.vector_store %arg19[%c0_67, %c1_68, %c0_69, %c0_70], %93 {strides = array<i32>} : memref<1x3x8x4xf32, #tpu.memory_space<vmem>>, vector<1x1x8x4xf32>,
    %94 = arith.mulf %68, %79 : vector<8x4xf32>
    %95 = arith.addf %68, %94 : vector<8x4xf32>
    %96 = vector.extract_strided_slice %73 {offsets = [0, 44], sizes = [8, 4], strides = [1, 1]} : vector<8x48xf32> to vector<8x4xf32>
    %97 = arith.subf %95, %96 : vector<8x4xf32>
    %c0_71 = arith.constant 0 : index
    %c2_72 = arith.constant 2 : index
    %c0_73 = arith.constant 0 : index
    %c0_74 = arith.constant 0 : index
    %98 = vector.load %arg19[%c0_71, %c2_72, %c0_73, %c0_74] : memref<1x3x8x4xf32, #tpu.memory_space<vmem>>, vector<1x1x8x4xf32>
    %99 = vector.shape_cast %98 : vector<1x1x8x4xf32> to vector<8x4xf32>
    %100 = vector.shape_cast %97 : vector<8x4xf32> to vector<1x1x8x4xf32>
    tpu.vector_store %arg19[%c0_71, %c2_72, %c0_73, %c0_74], %100 {strides = array<i32>} : memref<1x3x8x4xf32, #tpu.memory_space<vmem>>, vector<1x1x8x4xf32>,
    return
  }
  func.func @transform_0(%arg0: i32) -> (i32, i32, i32) {
    %c0_i32 = arith.constant 0 : i32
    %c0_i32_0 = arith.constant 0 : i32
    %c0_i32_1 = arith.constant 0 : i32
    return %arg0, %c0_i32, %c0_i32_0 : i32, i32, i32
  }
  func.func @transform_1(%arg0: i32) -> (i32, i32, i32, i32) {
    %c0_i32 = arith.constant 0 : i32
    %c0_i32_0 = arith.constant 0 : i32
    %c0_i32_1 = arith.constant 0 : i32
    %c0_i32_2 = arith.constant 0 : i32
    return %arg0, %c0_i32, %c0_i32_0, %c0_i32_1 : i32, i32, i32, i32
  }
  func.func @transform_2(%arg0: i32) -> (i32, i32) {
    %c0_i32 = arith.constant 0 : i32
    %c0_i32_0 = arith.constant 0 : i32
    %c0_i32_1 = arith.constant 0 : i32
    return %c0_i32, %c0_i32_0 : i32, i32
  }
  func.func @transform_3(%arg0: i32) -> (i32, i32) {
    %c0_i32 = arith.constant 0 : i32
    %c0_i32_0 = arith.constant 0 : i32
    %c0_i32_1 = arith.constant 0 : i32
    return %c0_i32, %c0_i32_0 : i32, i32
  }
  func.func @transform_4(%arg0: i32) -> (i32, i32) {
    %c0_i32 = arith.constant 0 : i32
    %c0_i32_0 = arith.constant 0 : i32
    %c0_i32_1 = arith.constant 0 : i32
    return %c0_i32, %c0_i32_0 : i32, i32
  }
  func.func @transform_5(%arg0: i32) -> (i32, i32) {
    %c0_i32 = arith.constant 0 : i32
    %c0_i32_0 = arith.constant 0 : i32
    %c0_i32_1 = arith.constant 0 : i32
    return %c0_i32, %c0_i32_0 : i32, i32
  }
  func.func @transform_6(%arg0: i32) -> (i32, i32) {
    %c0_i32 = arith.constant 0 : i32
    %c0_i32_0 = arith.constant 0 : i32
    %c0_i32_1 = arith.constant 0 : i32
    return %c0_i32, %c0_i32_0 : i32, i32
  }
  func.func @transform_7(%arg0: i32) -> (i32, i32) {
    %c0_i32 = arith.constant 0 : i32
    %c0_i32_0 = arith.constant 0 : i32
    %c0_i32_1 = arith.constant 0 : i32
    return %c0_i32, %c0_i32_0 : i32, i32
  }
  func.func @transform_8(%arg0: i32) -> (i32, i32) {
    %c0_i32 = arith.constant 0 : i32
    %c0_i32_0 = arith.constant 0 : i32
    %c0_i32_1 = arith.constant 0 : i32
    return %c0_i32, %c0_i32_0 : i32, i32
  }
  func.func @transform_9(%arg0: i32) -> (i32, i32) {
    %c0_i32 = arith.constant 0 : i32
    %c0_i32_0 = arith.constant 0 : i32
    %c0_i32_1 = arith.constant 0 : i32
    return %c0_i32, %c0_i32_0 : i32, i32
  }
  func.func @transform_10(%arg0: i32) -> (i32, i32) {
    %c0_i32 = arith.constant 0 : i32
    %c0_i32_0 = arith.constant 0 : i32
    %c0_i32_1 = arith.constant 0 : i32
    return %c0_i32, %c0_i32_0 : i32, i32
  }
  func.func @transform_11(%arg0: i32) -> (i32, i32) {
    %c0_i32 = arith.constant 0 : i32
    %c0_i32_0 = arith.constant 0 : i32
    %c0_i32_1 = arith.constant 0 : i32
    return %c0_i32, %c0_i32_0 : i32, i32
  }
  func.func @transform_12(%arg0: i32) -> (i32, i32) {
    %c0_i32 = arith.constant 0 : i32
    %c0_i32_0 = arith.constant 0 : i32
    %c0_i32_1 = arith.constant 0 : i32
    return %c0_i32, %c0_i32_0 : i32, i32
  }
  func.func @transform_13(%arg0: i32) -> (i32, i32) {
    %c0_i32 = arith.constant 0 : i32
    %c0_i32_0 = arith.constant 0 : i32
    %c0_i32_1 = arith.constant 0 : i32
    return %c0_i32, %c0_i32_0 : i32, i32
  }
  func.func @transform_14(%arg0: i32) -> (i32, i32) {
    %c0_i32 = arith.constant 0 : i32
    %c0_i32_0 = arith.constant 0 : i32
    %c0_i32_1 = arith.constant 0 : i32
    return %c0_i32, %c0_i32_0 : i32, i32
  }
  func.func @transform_15(%arg0: i32) -> (i32, i32) {
    %c0_i32 = arith.constant 0 : i32
    %c0_i32_0 = arith.constant 0 : i32
    %c0_i32_1 = arith.constant 0 : i32
    return %c0_i32, %c0_i32_0 : i32, i32
  }
  func.func @transform_16(%arg0: i32) -> (i32, i32) {
    %c0_i32 = arith.constant 0 : i32
    %c0_i32_0 = arith.constant 0 : i32
    %c0_i32_1 = arith.constant 0 : i32
    return %c0_i32, %c0_i32_0 : i32, i32
  }
  func.func @transform_17(%arg0: i32) -> (i32, i32, i32) {
    %c0_i32 = arith.constant 0 : i32
    %c0_i32_0 = arith.constant 0 : i32
    %c0_i32_1 = arith.constant 0 : i32
    return %arg0, %c0_i32, %c0_i32_0 : i32, i32, i32
  }
  func.func @transform_18(%arg0: i32) -> (i32, i32, i32, i32) {
    %c0_i32 = arith.constant 0 : i32
    %c0_i32_0 = arith.constant 0 : i32
    %c0_i32_1 = arith.constant 0 : i32
    %c0_i32_2 = arith.constant 0 : i32
    return %arg0, %c0_i32, %c0_i32_0, %c0_i32_1 : i32, i32, i32, i32
  }
}

</mosaic_0001>

<bundles_post_ra>
// kernel: tpu_custom_call.1
= control target key start
LH: loop header
LB: loop body
LE: loop exit
PB: predicated region body
PF: predicated region fallthrough
CT: control target
= control target key end

     0   :  { %s3280_s0 = inlined_call_operand.hbm [shape: f32[2,8,32], index: 0, kind: input, shape index: {}]   ;;  %s3281_s1 = inlined_call_operand.vmem [shape: f32[2,3,8,4], index: 1, kind: input, shape index: {}]   ;;  %s3282_s2 = inlined_call_operand.vmem [shape: f32[32,32], index: 2, kind: input, shape index: {}]   ;;  %s3283_s3 = inlined_call_operand.hbm [shape: f32[1,32], index: 3, kind: input, shape index: {}]   ;;  %s3284_s4 = inlined_call_operand.vmem [shape: f32[32,32], index: 4, kind: input, shape index: {}]   ;;  %s3285_s5 = inlined_call_operand.hbm [shape: f32[1,32], index: 5, kind: input, shape index: {}]   ;;  %s3286_s6 = inlined_call_operand.vmem [shape: f32[32,32], index: 6, kind: input, shape index: {}]   ;;  %s3287_s7 = inlined_call_operand.hbm [shape: f32[1,32], index: 7, kind: input, shape index: {}]   ;;  %s3288_s8 = inlined_call_operand.vmem [shape: f32[32,32], index: 8, kind: input, shape index: {}]   ;;  %s3289_s9 = inlined_call_operand.hbm [shape: f32[1,32], index: 9, kind: input, shape index: {}]   ;;  %s3290_s10 = inlined_call_operand.hbm [shape: f32[32,32], index: 10, kind: input, shape index: {}]   ;;  %s3291_s11 = inlined_call_operand.hbm [shape: f32[1,32], index: 11, kind: input, shape index: {}]   ;;  %s3292_s12 = inlined_call_operand.hbm [shape: f32[32,32], index: 12, kind: input, shape index: {}]   ;;  %s3293_s13 = inlined_call_operand.hbm [shape: f32[1,32], index: 13, kind: input, shape index: {}]   ;;  %s3294_s14 = inlined_call_operand.vmem [shape: f32[32,32], index: 14, kind: input, shape index: {}]   ;;  %s3295_s15 = inlined_call_operand.hbm [shape: f32[1,32], index: 15, kind: input, shape index: {}]   ;;  %s3296_s16 = inlined_call_operand.vmem [shape: f32[32,4], index: 16, kind: input, shape index: {}]   ;;  %s3297_s17 = inlined_call_operand.hbm [shape: f32[2,8,32], index: 17, kind: output, shape index: {0}]   ;;  %s3298_s18 = inlined_call_operand.vmem [shape: f32[2,3,8,4], index: 18, kind: output, shape index: {1}]  }
   0x1   :  { %3316 = sst [smem:[#allocation27_spill]] %s3280_s0 }
   0x2   :  { %3317 = sst [smem:[#allocation28_spill]] %s3281_s1 }
   0x3   :  { %3318 = sst [smem:[#allocation29_spill]] %s3282_s2 }
   0x4   :  { %3319 = sst [smem:[#allocation30_spill]] %s3283_s3 }
   0x5   :  { %3320 = sst [smem:[#allocation31_spill]] %s3284_s4 }
   0x6   :  { %3321 = sst [smem:[#allocation32_spill]] %s3285_s5 }
   0x7   :  { %3322 = sst [smem:[#allocation33_spill]] %s3286_s6 }
   0x8   :  { %3323 = sst [smem:[#allocation34_spill]] %s3287_s7 }
   0x9   :  { %3324 = sst [smem:[#allocation35_spill]] %s3288_s8 }
   0xa   :  { %3325 = sst [smem:[#allocation36_spill]] %s3294_s14 }
   0xb   :  { %3326 = sst [smem:[#allocation37_spill]] %s3296_s16 }
   0xc   :  { %3327 = sst [smem:[#allocation38_spill]] %s3297_s17 }
   0xd   :  { %3328 = sst [smem:[#allocation39_spill]] %s3298_s18 }
   0xe   :  { %24 = vsyncpa [#allocation3], 0 }
   0xf   :  { %26 = vsyncpa [#allocation3 + $0x1], 0 }
  0x10   :  { %27 = vsyncpa [#allocation6], 0 }
  0x11   :  { %28 = vsyncpa [#allocation9], 0 }
  0x12   :  { %29 = vsyncpa [#allocation12], 0 }
  0x13   :  { %30 = vsyncpa [#allocation15], 0 }
  0x14   :  { %31 = vsyncpa [#allocation18], 0 }
  0x15   :  { %32 = vsyncpa [#allocation4], 0 }
  0x16   :  { %34 = vsyncpa [#allocation4 + $0x1], 0  ;;  %s2734_s27 = smov 0   ;;  %s2736_s28 = smov 0  }
  0x17   :  { %s2738_s29 = smov 0   ;;  %s2740_s30 = smov 0  }
  0x18 LB: > { %s2615_s0 = smov [#allocation5]   ;;  %s2755_s1 = sadd.s32 4294967295, %s2613_s30   ;;  %s2613_s30 = sphi %s2740_s30, %s3369_s30   ;;  %s2609_s29 = sphi %s2738_s29, %s3368_s29   ;;  %s2605_s28 = sphi %s2736_s28, %s3367_s28   ;;  %s2601_s27 = sphi %s2734_s27, %s3366_s27  }
  0x19   : > { %s480_s19 = sshll.u32 %s2615_s0, 4  ;;  %p1847_p0 = scmp.ge.s32.totalorder %s2613_s30, 1  ;;  %s2760_s19 = int_to_ptr.vmem [resolvable:$true] %s480_s19 }
  0x1a   : > { %p3307_p1 = scmp.eq.s32.totalorder %s2755_s1, 0  ;;  %p464_p2 = scmp.lt.s32.totalorder %s2613_s30, 3 }
  0x1b   : > { %s2616_s21 = smov [#allocation8]   ;;  %s2617_s2 = smov [#allocation11]  }
  0x1c   : > { %p2762_p3 = pnand %p1847_p0, %p464_p2  ;;  %s508_s22 = sshll.u32 %s2616_s21, 4  ;;  %s2769_s22 = int_to_ptr.vmem [resolvable:$true] %s508_s22 }
  0x1d   : > { %s532_s23 = sshll.u32 %s2617_s2, 4  ;;  %s3331_s3 = sld [smem:[#allocation30_spill]]  ;;  %s2777_s23 = int_to_ptr.vmem [resolvable:$true] %s532_s23 }
  0x1e   : > { %s3329_s20 = scalar_select %p2762_p3, 1, 0 }
  0x1f   : > { %p2131_p5 = pneg %p2762_p3 }
  0x21   : > { %p2773_p6 = pnand %p2131_p5, %p3307_p1 }
  0x23   : > { %s2245_s0 = scalar_lea.hbm %s3331_s3, 16  ;;  %p2787_p8 = pneg %p2773_p6 }
  0x24   : > { %p2246_p7 = scmp.ne.s32.totalorder %s3331_s3, %s2245_s0  ;;  %p2252_p11 = scmp.lt.u32.totalorder %s2245_s0, %s3331_s3 }
  0x26   : > { %p2248_p9 = pnand %p2787_p8, %p2246_p7 }
  0x28   : > { %p2249_p10 = pneg %p2248_p9 }
  0x2a   : > { %p2254_p12 = pnand %p2252_p11, %p2249_p10 }
  0x2c   : > { %2257 = shalt.err (!%p2254_p12)
}
  0x2d   : > { %s2258_s17 = scalar_lea.vmem %s2760_s19, 16  ;;  %s2265_s18 = scalar_lea.vmem %s2760_s19, 32 }
  0x2e   : > { %p2259_p13 = scmp.ne.s32.totalorder %s2760_s19, %s2258_s17  ;;  %p2266_p5 = scmp.lt.s32.totalorder %s2760_s19, %s2760_s19 }
  0x2f   : > { %p2267_p7 = scmp.lt.s32.totalorder %s2265_s18, %s2258_s17 }
  0x30   : > { %p2261_p0 = pnand %p2259_p13, %p2787_p8 }
  0x31   : > { %p2268_p9 = por %p2267_p7, %p2266_p5 }
  0x32   : > { %p2262_p2 = pneg %p2261_p0 }
  0x34   : > { %p2269_p4 = pnand %p2268_p9, %p2262_p2 }
  0x36   : > { %2272 = shalt.err (!%p2269_p4)
}
  0x37   : > { %2134 = dma.hbm_to_vmem [thread:$0]  (!%p2773_p6), %s3331_s3, 16, %s2760_s19, [#allocation6]  }
  0x38   : > { %s3333_s7 = sld [smem:[#allocation34_spill]] }
  0x3e   : > { %s2273_s2 = scalar_lea.hbm %s3333_s7, 16 }
  0x3f   : > { %p2274_p10 = scmp.ne.s32.totalorder %s3333_s7, %s2273_s2  ;;  %p2280_p4 = scmp.lt.u32.totalorder %s2273_s2, %s3333_s7 }
  0x41   : > { %p2276_p11 = pnand %p2274_p10, %p2787_p8 }
  0x43   : > { %p2277_p12 = pneg %p2276_p11 }
  0x45   : > { %p2282_p13 = pnand %p2280_p4, %p2277_p12 }
  0x47   : > { %2285 = shalt.err (!%p2282_p13)
}
  0x48   : > { %s2286_s19 = scalar_lea.vmem %s2769_s22, 16  ;;  %s2293_s8 = scalar_lea.vmem %s2769_s22, 32 }
  0x49   : > { %p2287_p0 = scmp.ne.s32.totalorder %s2769_s22, %s2286_s19  ;;  %p2294_p7 = scmp.lt.s32.totalorder %s2769_s22, %s2769_s22 }
  0x4a   : > { %p2295_p9 = scmp.lt.s32.totalorder %s2293_s8, %s2286_s19 }
  0x4b   : > { %p2289_p2 = pnand %p2287_p0, %p2787_p8 }
  0x4c   : > { %p2296_p10 = por %p2295_p9, %p2294_p7 }
  0x4d   : > { %p2290_p5 = pneg %p2289_p2 }
  0x4f   : > { %p2297_p11 = pnand %p2296_p10, %p2290_p5 }
  0x51   : > { %2300 = shalt.err (!%p2297_p11)
}
  0x52   : > { %2140 = dma.hbm_to_vmem [thread:$0]  (!%p2773_p6), %s3333_s7, 16, %s2769_s22, [#allocation9]  }
  0x53   : > { %s2301_s0 = scalar_lea.hbm %s3290_s10, 512 }
  0x54   : > { %p2302_p12 = scmp.ne.s32.totalorder %s3290_s10, %s2301_s0  ;;  %p2308_p0 = scmp.lt.u32.totalorder %s2301_s0, %s3290_s10 }
  0x56   : > { %p2304_p4 = pnand %p2302_p12, %p2787_p8 }
  0x58   : > { %p2305_p13 = pneg %p2304_p4 }
  0x5a   : > { %p2310_p2 = pnand %p2308_p0, %p2305_p13 }
  0x5c   : > { %2313 = shalt.err (!%p2310_p2)
}
  0x5d   : > { %s2314_s22 = scalar_lea.vmem %s2777_s23, 512  ;;  %p2322_p10 = scmp.lt.s32.totalorder %s2777_s23, %s2777_s23 }
  0x5e   : > { %p2315_p5 = scmp.ne.s32.totalorder %s2777_s23, %s2314_s22  ;;  %p2323_p11 = scmp.lt.s32.totalorder %s2314_s22, %s2314_s22 }
  0x60   : > { %p2317_p7 = pnand %p2315_p5, %p2787_p8  ;;  %p2324_p12 = por %p2323_p11, %p2322_p10 }
  0x62   : > { %p2318_p9 = pneg %p2317_p7 }
  0x64   : > { %p2325_p4 = pnand %p2324_p12, %p2318_p9 }
  0x66   : > { %2328 = shalt.err (!%p2325_p4)
}
  0x67   : > { %s2618_s8 = smov 128   ;;  %s2619_s14 = smov 8  }
  0x68   : > { %2146 = dma.hbm_to_vmem [thread:$0]  (!%p2773_p6), %s3290_s10, 512, %s2777_s23, [#allocation12], %s2618_s8, %s2618_s8, %s2619_s14  }
  0x69   : > { %s2620_s26 = smov [#allocation14]   ;;  %s2621_s2 = smov [#allocation7]  }
  0x6a   : > { %s556_s0 = sshll.u32 %s2620_s26, 4  ;;  %s494_s17 = sshll.u32 %s2621_s2, 4  ;;  %s557_s0 = int_to_ptr.vmem [resolvable:$true] %s556_s0  ;;  %s495_s17 = int_to_ptr.vmem [resolvable:$true] %s494_s17 }
  0x6b   : > { %s2329_s22 = scalar_lea.hbm %s3292_s12, 512 }
  0x6c   : > { %p2330_p13 = scmp.ne.s32.totalorder %s3292_s12, %s2329_s22  ;;  %p2336_p5 = scmp.lt.u32.totalorder %s2329_s22, %s3292_s12 }
  0x6e   : > { %p2332_p0 = pnand %p2330_p13, %p2787_p8 }
  0x70   : > { %p2333_p2 = pneg %p2332_p0 }
  0x72   : > { %p2338_p7 = pnand %p2336_p5, %p2333_p2 }
  0x74   : > { %2341 = shalt.err (!%p2338_p7)
}
  0x75   : > { %s2342_s23 = scalar_lea.vmem %s557_s0, 512  ;;  %p2350_p12 = scmp.lt.s32.totalorder %s557_s0, %s557_s0 }
  0x76   : > { %p2343_p9 = scmp.ne.s32.totalorder %s557_s0, %s2342_s23  ;;  %p2351_p4 = scmp.lt.s32.totalorder %s2342_s23, %s2342_s23 }
  0x78   : > { %p2345_p10 = pnand %p2343_p9, %p2787_p8  ;;  %p2352_p1 = por %p2351_p4, %p2350_p12 }
  0x7a   : > { %p2346_p11 = pneg %p2345_p10 }
  0x7c   : > { %p2353_p3 = pnand %p2352_p1, %p2346_p11 }
  0x7e   : > { %2356 = shalt.err (!%p2353_p3)
}
  0x7f   : > { %2152 = dma.hbm_to_vmem [thread:$0]  (!%p2773_p6), %s3292_s12, 512, %s557_s0, [#allocation15], %s2618_s8, %s2618_s8, %s2619_s14  }
  0x80   : > { %s3334_s5 = sld [smem:[#allocation32_spill]] }
  0x86   : > { %s2357_s16 = scalar_lea.hbm %s3334_s5, 16 }
  0x87   : > { %p2358_p13 = scmp.ne.s32.totalorder %s3334_s5, %s2357_s16  ;;  %p2364_p3 = scmp.lt.u32.totalorder %s2357_s16, %s3334_s5 }
  0x89   : > { %p2360_p0 = pnand %p2358_p13, %p2787_p8 }
  0x8b   : > { %p2361_p1 = pneg %p2360_p0 }
  0x8d   : > { %p2366_p2 = pnand %p2364_p3, %p2361_p1 }
  0x8f   : > { %2369 = shalt.err (!%p2366_p2)
}
  0x90   : > { %s2370_s19 = scalar_lea.vmem %s495_s17, 16  ;;  %s2377_s8 = scalar_lea.vmem %s495_s17, 32 }
  0x91   : > { %p2371_p5 = scmp.ne.s32.totalorder %s495_s17, %s2370_s19  ;;  %p2378_p10 = scmp.lt.s32.totalorder %s495_s17, %s495_s17 }
  0x92   : > { %p2379_p11 = scmp.lt.s32.totalorder %s2377_s8, %s2370_s19 }
  0x93   : > { %p2373_p7 = pnand %p2371_p5, %p2787_p8 }
  0x94   : > { %p2380_p12 = por %p2379_p11, %p2378_p10 }
  0x95   : > { %p2374_p9 = pneg %p2373_p7 }
  0x97   : > { %p2381_p4 = pnand %p2380_p12, %p2374_p9 }
  0x99   : > { %2384 = shalt.err (!%p2381_p4)
}
  0x9a   : > { %2137 = dma.hbm_to_vmem [thread:$0]  (!%p2773_p6), %s3334_s5, 16, %s495_s17, [#allocation6]  }
  0x9b   : > { %s2622_s22 = smov [#allocation10]   ;;  %s2623_s3 = smov [#allocation13]  }
  0x9c   : > { %s522_s23 = sshll.u32 %s2622_s22, 4  ;;  %s546_s7 = sshll.u32 %s2623_s3, 4  ;;  %s523_s23 = int_to_ptr.vmem [resolvable:$true] %s522_s23  ;;  %s547_s7 = int_to_ptr.vmem [resolvable:$true] %s546_s7 }
  0x9d   : > { %s2385_s16 = scalar_lea.hbm %s3289_s9, 16 }
  0x9e   : > { %p2386_p13 = scmp.ne.s32.totalorder %s3289_s9, %s2385_s16  ;;  %p2392_p3 = scmp.lt.u32.totalorder %s2385_s16, %s3289_s9 }
  0xa0   : > { %p2388_p0 = pnand %p2386_p13, %p2787_p8 }
  0xa2   : > { %p2389_p1 = pneg %p2388_p0 }
  0xa4   : > { %p2394_p2 = pnand %p2392_p3, %p2389_p1 }
  0xa6   : > { %2397 = shalt.err (!%p2394_p2)
}
  0xa7   : > { %s2398_s17 = scalar_lea.vmem %s523_s23, 16  ;;  %s2405_s19 = scalar_lea.vmem %s523_s23, 32 }
  0xa8   : > { %p2399_p5 = scmp.ne.s32.totalorder %s523_s23, %s2398_s17  ;;  %p2406_p10 = scmp.lt.s32.totalorder %s523_s23, %s523_s23 }
  0xa9   : > { %p2407_p11 = scmp.lt.s32.totalorder %s2405_s19, %s2398_s17 }
  0xaa   : > { %p2401_p7 = pnand %p2399_p5, %p2787_p8 }
  0xab   : > { %p2408_p12 = por %p2407_p11, %p2406_p10 }
  0xac   : > { %p2402_p9 = pneg %p2401_p7 }
  0xae   : > { %p2409_p4 = pnand %p2408_p12, %p2402_p9 }
  0xb0   : > { %2412 = shalt.err (!%p2409_p4)
}
  0xb1   : > { %2143 = dma.hbm_to_vmem [thread:$0]  (!%p2773_p6), %s3289_s9, 16, %s523_s23, [#allocation9]  }
  0xb2   : > { %s2413_s3 = scalar_lea.hbm %s3291_s11, 16 }
  0xb3   : > { %p2414_p13 = scmp.ne.s32.totalorder %s3291_s11, %s2413_s3  ;;  %p2420_p3 = scmp.lt.u32.totalorder %s2413_s3, %s3291_s11 }
  0xb5   : > { %p2416_p0 = pnand %p2414_p13, %p2787_p8 }
  0xb7   : > { %p2417_p1 = pneg %p2416_p0 }
  0xb9   : > { %p2422_p2 = pnand %p2420_p3, %p2417_p1 }
  0xbb   : > { %2425 = shalt.err (!%p2422_p2)
}
  0xbc   : > { %s2426_s26 = scalar_lea.vmem %s547_s7, 16  ;;  %s2433_s23 = scalar_lea.vmem %s547_s7, 32 }
  0xbd   : > { %p2427_p5 = scmp.ne.s32.totalorder %s547_s7, %s2426_s26  ;;  %p2434_p10 = scmp.lt.s32.totalorder %s547_s7, %s547_s7 }
  0xbe   : > { %p2435_p11 = scmp.lt.s32.totalorder %s2433_s23, %s2426_s26 }
  0xbf   : > { %p2429_p7 = pnand %p2427_p5, %p2787_p8 }
  0xc0   : > { %p2436_p12 = por %p2435_p11, %p2434_p10 }
  0xc1   : > { %p2430_p9 = pneg %p2429_p7 }
  0xc3   : > { %p2437_p4 = pnand %p2436_p12, %p2430_p9 }
  0xc5   : > { %2440 = shalt.err (!%p2437_p4)
}
  0xc6   : > { %2149 = dma.hbm_to_vmem [thread:$0]  (!%p2773_p6), %s3291_s11, 16, %s547_s7, [#allocation12]  }
  0xc7   : > { %s2624_s17 = smov [#allocation16]   ;;  %s2625_s8 = smov [#allocation17]  }
  0xc8   : > { %s570_s19 = sshll.u32 %s2624_s17, 4  ;;  %s584_s14 = sshll.u32 %s2625_s8, 4  ;;  %s571_s19 = int_to_ptr.vmem [resolvable:$true] %s570_s19  ;;  %s585_s14 = int_to_ptr.vmem [resolvable:$true] %s584_s14 }
  0xc9   : > { %s2441_s3 = scalar_lea.hbm %s3293_s13, 16 }
  0xca   : > { %p2442_p13 = scmp.ne.s32.totalorder %s3293_s13, %s2441_s3  ;;  %p2448_p3 = scmp.lt.u32.totalorder %s2441_s3, %s3293_s13 }
  0xcc   : > { %p2444_p0 = pnand %p2442_p13, %p2787_p8 }
  0xce   : > { %p2445_p1 = pneg %p2444_p0 }
  0xd0   : > { %p2450_p2 = pnand %p2448_p3, %p2445_p1 }
  0xd2   : > { %2453 = shalt.err (!%p2450_p2)
}
  0xd3   : > { %s2454_s7 = scalar_lea.vmem %s571_s19, 16  ;;  %s2461_s26 = scalar_lea.vmem %s571_s19, 32 }
  0xd4   : > { %p2455_p5 = scmp.ne.s32.totalorder %s571_s19, %s2454_s7  ;;  %p2462_p10 = scmp.lt.s32.totalorder %s571_s19, %s571_s19 }
  0xd5   : > { %p2463_p11 = scmp.lt.s32.totalorder %s2461_s26, %s2454_s7 }
  0xd6   : > { %p2457_p7 = pnand %p2455_p5, %p2787_p8 }
  0xd7   : > { %p2464_p12 = por %p2463_p11, %p2462_p10 }
  0xd8   : > { %p2458_p9 = pneg %p2457_p7 }
  0xda   : > { %p2465_p4 = pnand %p2464_p12, %p2458_p9 }
  0xdc   : > { %2468 = shalt.err (!%p2465_p4)
}
  0xdd   : > { %2155 = dma.hbm_to_vmem [thread:$0]  (!%p2773_p6), %s3293_s13, 16, %s571_s19, [#allocation15]  }
  0xde   : > { %s2469_s8 = scalar_lea.hbm %s3295_s15, 16 }
  0xdf   : > { %p2470_p13 = scmp.ne.s32.totalorder %s3295_s15, %s2469_s8  ;;  %p2476_p3 = scmp.lt.u32.totalorder %s2469_s8, %s3295_s15 }
  0xe1   : > { %p2472_p0 = pnand %p2470_p13, %p2787_p8 }
  0xe3   : > { %p2473_p1 = pneg %p2472_p0 }
  0xe5   : > { %p2478_p2 = pnand %p2476_p3, %p2473_p1 }
  0xe7   : > { %2481 = shalt.err (!%p2478_p2)
}
  0xe8   : > { %s2482_s6 = scalar_lea.vmem %s585_s14, 16  ;;  %s2489_s19 = scalar_lea.vmem %s585_s14, 32 }
  0xe9   : > { %p2483_p5 = scmp.ne.s32.totalorder %s585_s14, %s2482_s6  ;;  %p2490_p10 = scmp.lt.s32.totalorder %s585_s14, %s585_s14 }
  0xea   : > { %p2491_p11 = scmp.lt.s32.totalorder %s2489_s19, %s2482_s6 }
  0xeb   : > { %p2485_p7 = pnand %p2483_p5, %p2787_p8 }
  0xec   : > { %p2492_p12 = por %p2491_p11, %p2490_p10 }
  0xed   : > { %p2486_p9 = pneg %p2485_p7 }
  0xef   : > { %p2493_p4 = pnand %p2492_p12, %p2486_p9 }
  0xf1   : > { %2496 = shalt.err (!%p2493_p4)
}
  0xf2   : > { %2158 = dma.hbm_to_vmem [thread:$0]  (!%p2773_p6), %s3295_s15, 16, %s585_s14, [#allocation18]  }
  0xf3   : > { %s1846_s21 = sadd.s32 4294967294, %s2613_s30   ;;  %s2966_s24 = sadd.s32 1, %s2613_s30  }
  0xf4   : > { %s47_s7 = sadd.s32 1, %s2609_s29  ;;  %s44_s26 = ssub.s32 %s2613_s30, %s2966_s24 }
  0xf5   : > { %p54_p8 = scmp.ne.s32.totalorder %s2609_s29, %s2605_s28  ;;  %p45_p13 = scmp.eq.s32.totalorder %s44_s26, 0 }
  0xf6   : > { %p55_p0 = scmp.eq.s32.totalorder %s2613_s30, 0  ;;  %p60_p1 = scmp.ne.s32.totalorder %s2605_s28, %s2601_s27 }
  0xf7   : > { %p425_p3 = scmp.eq.s32.totalorder %s2755_s1, 1  ;;  %p3335_p5 = scmp.eq.s32.totalorder %s2755_s1, 0 }
  0xf8   : > { %s2978_s23 = scalar_select %p45_p13, %s2609_s29, %s47_s7  }
  0xf9   : > { %p56_p2 = por %p55_p0, %p54_p8  ;;  %p2982_p7 = por %p3335_p5, %p60_p1 }
  0xfa   : > { %p2986_p6 = por %p425_p3, %p54_p8  ;;  %p431_p9 = scmp.eq.s32.totalorder %s1846_s21, 1 }
  0xfb   : > { %p2176_p10 = scmp.lt.s32.totalorder %s2613_s30, 2  ;;  %s598_s18 = sand.u32 1, %s2609_s29  }
  0xfc   : > { %s3337_s14 = scalar_select %p2986_p6, 1, 0 }
  0xfd   : > { %p2992_p11 = por %p431_p9, %p60_p1  ;;  %s1858_s8 = sshll.u32 %s598_s18, 3 }
  0xfe   : > { %s1859_s0 = sshll.u32 %s2613_s30, 7  ;;  %s3339_s4 = sld [smem:[#allocation27_spill]] }
  0xff   : > { %s3338_s17 = scalar_select %p2992_p11, 1, 0 }
 0x100   : > { %s602_s19 = scalar_lea.vmem [#allocation2], %s1858_s8  ;;  %p3002_p12 = pnand %p2176_p10, %p56_p2 }
 0x101   : > { %s609_s16 = sshll.u32 %s602_s19, 4  ;;  %s599_s21 = scalar_lea.sflag [#allocation3], %s598_s18  ;;  %s3006_s16 = int_to_ptr.vmem [resolvable:$true] %s609_s16 }
 0x102   : > { %p2499_p8 = pneg %p3002_p12 }
 0x104   : > { %s3000_s6 = scalar_lea.hbm %s3339_s4, %s1859_s0  ;;  %s2502_s0 = scalar_lea.hbm %s3339_s4, 256 }
 0x105   : > { %s2497_s7 = scalar_lea.hbm %s3000_s6, 128  ;;  %p2503_p1 = scmp.lt.u32.totalorder %s3000_s6, %s3339_s4 }
 0x106   : > { %p2498_p4 = scmp.ne.s32.totalorder %s3000_s6, %s2497_s7  ;;  %p2504_p3 = scmp.lt.u32.totalorder %s2502_s0, %s2497_s7 }
 0x107   : > { %p2506_p5 = scmp.lt.u32.totalorder %s2497_s7, %s3000_s6 }
 0x108   : > { %p2500_p13 = pnand %p2499_p8, %p2498_p4  ;;  %p2505_p2 = por %p2504_p3, %p2503_p1 }
 0x10a   : > { %p2501_p0 = pneg %p2500_p13  ;;  %p2507_p9 = por %p2506_p5, %p2505_p2 }
 0x10c   : > { %p2508_p10 = pnand %p2507_p9, %p2501_p0 }
 0x10e   : > { %2511 = shalt.err (!%p2508_p10)
}
 0x10f   : > { %s2512_s18 = scalar_lea.vmem %s3006_s16, 128  ;;  %s2626_s19 = smov [#allocation2]  }
 0x110   : > { %p2513_p4 = scmp.ne.s32.totalorder %s3006_s16, %s2512_s18  ;;  %s2517_s26 = sshll.u32 %s2626_s19, 4  ;;  %s2518_s26 = int_to_ptr.vmem [resolvable:$false] %s2517_s26 }
 0x111   : > { %s2519_s8 = scalar_lea.vmem %s2518_s26, 256  ;;  %p2520_p6 = scmp.lt.s32.totalorder %s3006_s16, %s2518_s26 }
 0x112   : > { %p2515_p13 = pnand %p2513_p4, %p2499_p8  ;;  %p2521_p1 = scmp.lt.s32.totalorder %s2519_s8, %s2512_s18 }
 0x114   : > { %p2516_p11 = pneg %p2515_p13  ;;  %p2522_p3 = por %p2521_p1, %p2520_p6 }
 0x116   : > { %p2523_p2 = pnand %p2522_p3, %p2516_p11 }
 0x118   : > { %2526 = shalt.err (!%p2523_p2)
}
 0x119   : > { %2162 = dma.hbm_to_vmem [thread:$0]  (!%p3002_p12), %s3000_s6, 128, %s3006_s16, %s599_s21  }
 0x11a   : > { %p3341_p0 = scmp.ne.s32.totalorder %s3329_s20, 0 }
 0x11b   : > { %s3036_s7 = sand.u32 (!%p3341_p0), 1, %s2605_s28  }
 0x11c   : > { %626 = sbr.rel (%p3341_p0) target bundleno = 1685 (0x695), region = 88  ;;  %s3310_s0 = sshll.u32 (!%p3341_p0), %s3036_s7, 3 }
 0x11d   : > { %s629_s22 = scalar_lea.sflag (!%p3341_p0), [#allocation3], %s3036_s7  ;;  %s3042_s3 = scalar_lea.vmem (!%p3341_p0), [#allocation2], %s3310_s0 }
 0x123   : > { %2572 = dma.done.wait (%p2982_p7), %s629_s22, 128  }
 0x124   : > { %2574 = vsyncadd (%p2982_p7), %s629_s22, 4294967168  ;;  %p3342_p6 = scmp.eq.s32.totalorder %s2755_s1, 0 }
 0x126   : > { %2576 = dma.done.wait (%p3342_p6), [#allocation6], 32   ;;  %p3343_p11 = pmov %p3342_p6 }
 0x127   : > { %p3344_p12 = pmov %p3342_p6 }
 0x128   : > { %2578 = vsyncadd (%p3343_p11), [#allocation6], 4294967264 }
 0x129   : > { %2580 = dma.done.wait (%p3344_p12), [#allocation9], 32   ;;  %p3345_p8 = pmov %p3342_p6 }
 0x12a   : > { %p3346_p5 = pmov %p3342_p6 }
 0x12b   : > { %2582 = vsyncadd (%p3345_p8), [#allocation9], 4294967264 }
 0x12c   : > { %2584 = dma.done.wait (%p3346_p5), [#allocation12], 528   ;;  %p3347_p9 = pmov %p3346_p5 }
 0x12d   : > { %p3348_p7 = pmov %p3346_p5 }
 0x12e   : > { %2586 = vsyncadd (%p3347_p9), [#allocation12], 4294966768 }
 0x12f   : > { %2588 = dma.done.wait (%p3348_p7), [#allocation15], 528   ;;  %p3349_p10 = pmov %p3346_p5 }
 0x130   : > { %p3350_p4 = pmov %p3346_p5 }
 0x131   : > { %2590 = vsyncadd (%p3349_p10), [#allocation15], 4294966768 }
 0x132   : > { %2592 = dma.done.wait (%p3350_p4), [#allocation18], 16   ;;  %p3351_p13 = pmov %p3350_p4 }
 0x133   : > { %v2627_v0 = vmov 0.0|0.0   ;;  %vm2628_vm0 = vmmov 0   ;;  %v2629_v1 = vmov 0.0   ;;  %s3352_s6 = sld [smem:[#allocation29_spill]]  ;;  %s3353_s0 = sld [smem:[#allocation33_spill]]  ;;  %v3100_v13 = vld [vmem:[%s3042_s3] sm:$0xff] }
 0x134   : > { %2594 = vsyncadd (%p3351_p13), [#allocation18], 4294967280  ;;  %2042 = vmatprep.subr.bf16.mxu0 %v2627_v0  ;;  %1952 = vmatprep.mubr.msk.f32.mxu0 %vm2628_vm0, %v2629_v1  ;;  %s3354_s21 = sld [smem:[#allocation31_spill]]  ;;  %vm753_vm1 = vcmask 261120   ;;  %v1080_v18 = vld [vmem:[#allocation11] sm:$0xff]  ;;  %v1081_v19 = vld [vmem:[#allocation11 + $0x8] sm:$0xff] }
 0x135   : > { %2048 = vmatprep.subr.bf16.mxu1 %v2627_v0  ;;  %1963 = vmatprep.mubr.msk.f32.mxu1 %vm2628_vm0, %v2629_v1  ;;  %v2067_v20 = vpack.c.bf16 %v1081_v19, %v1080_v18  ;;  %v1082_v21 = vld [vmem:[#allocation11 + $0x10] sm:$0xff]  ;;  %v1083_v22 = vld [vmem:[#allocation11 + $0x18] sm:$0xff]  ;;  %s3355_s18 = sld [smem:[#allocation35_spill]]  ;;  %v1162_v39 = vld [vmem:[#allocation14] sm:$0xff]  ;;  %s3356_s16 = sld [smem:[#allocation36_spill]]  ;;  %vm1323_vm2 = vcmask 64512  }
 0x136   : > { %v2070_v23 = vpack.c.bf16 %v1083_v22, %v1082_v21  ;;  %v1874_v27 = vld [vmem:[#allocation5] ss:$0 sm:$0xff]  ;;  %v1878_v37 = vld [vmem:[#allocation8] ss:$0 sm:$0xff]  ;;  %v1163_v40 = vld [vmem:[#allocation14 + $0x8] sm:$0xff]  ;;  %s3357_s2 = sld [smem:[#allocation37_spill]] }
 0x137   : > { %v2073_v44 = vpack.c.bf16 %v1163_v40, %v1162_v39  ;;  %v1164_v46 = vld [vmem:[#allocation14 + $0x10] sm:$0xff]  ;;  %v1165_v47 = vld [vmem:[#allocation14 + $0x18] sm:$0xff]  ;;  %v1888_v22 = vld [vmem:[#allocation17] ss:$0 sm:$0xff]  ;;  %p731_p1 = scmp.lt.s32.totalorder %s2755_s1, 1  ;;  %s3358_s26 = sld [smem:[#allocation28_spill]] }
 0x138   : > { %v1882_v48 = vld [vmem:[#allocation13] ss:$0 sm:$0xff]  ;;  %v2076_v49 = vpack.c.bf16 %v1165_v47, %v1164_v46  ;;  %v1880_v62 = vld [vmem:[#allocation10] ss:$0 sm:$0xff]  ;;  %v1876_v63 = vld [vmem:[#allocation7] ss:$0 sm:$0xff] }
 0x139   : > { %v742_v2 = vld [vmem:[%s3352_s6] sm:$0xff]  ;;  %v743_v3 = vld [vmem:[%s3352_s6 + $0x8] sm:$0xff]  ;;  %v744_v4 = vld [vmem:[%s3352_s6 + $0x10] sm:$0xff]  ;;  %s3198_s3 = scalar_select %p731_p1, %s2755_s1, 1  ;;  %vm1522_vm3 = vcmask 293888   ;;  %vm1524_vm4 = vcmask 326656  }
 0x13a   : > { %v2043_v5 = vpack.c.bf16 %v743_v3, %v742_v2  ;;  %v745_v6 = vld [vmem:[%s3352_s6 + $0x18] sm:$0xff]  ;;  %v913_v8 = vld [vmem:[%s3353_s0] sm:$0xff]  ;;  %v914_v9 = vld [vmem:[%s3353_s0 + $0x8] sm:$0xff]  ;;  %s2630_s22 = smov 32   ;;  %s2631_s4 = smov 40   ;;  %vm1526_vm5 = vcmask 359424  }
 0x13b   : > { %v2046_v7 = vpack.c.bf16 %v745_v6, %v744_v4  ;;  %v828_v10 = vld [vmem:[%s3354_s21] sm:$0xff]  ;;  %v829_v11 = vld [vmem:[%s3354_s21 + $0x8] sm:$0xff]  ;;  %v2055_v14 = vpack.c.bf16 %v914_v9, %v913_v8  ;;  %v915_v15 = vld [vmem:[%s3353_s0 + $0x10] sm:$0xff]  ;;  %s3313_s20 = smul.u32 24, %s3198_s3  ;;  %s2633_s25 = smov 44  }
 0x13c   : > { %2044 = vmatpush3.bf16.msra.mxu0 %v2043_v5  ;;  %v2049_v12 = vpack.c.bf16 %v829_v11, %v828_v10  ;;  %v916_v16 = vld [vmem:[%s3353_s0 + $0x18] sm:$0xff]  ;;  %v830_v24 = vld [vmem:[%s3354_s21 + $0x10] sm:$0xff]  ;;  %v995_v28 = vld [vmem:[%s3355_s18] sm:$0xff]  ;;  %s2632_s0 = smov 36   ;;  %s3359_s19 = sshll.u32 %s3036_s7, 3 }
 0x13d   : > { %2045 = vmatprep.subr.bf16.mxu0 %v2627_v0  ;;  %v2058_v17 = vpack.c.bf16 %v916_v16, %v915_v15  ;;  %v831_v25 = vld [vmem:[%s3354_s21 + $0x18] sm:$0xff]  ;;  %v996_v29 = vld [vmem:[%s3355_s18 + $0x8] sm:$0xff]  ;;  %v997_v35 = vld [vmem:[%s3355_s18 + $0x10] sm:$0xff]  ;;  %s735_s8 = scalar_lea.vmem %s3358_s26, %s3313_s20  ;;  %s723_s26 = scalar_lea.vmem [#allocation19], %s3359_s19 }
 0x13e   : > { %2050 = vmatpush3.bf16.msra.mxu1 %v2049_v12  ;;  %v2052_v26 = vpack.c.bf16 %v831_v25, %v830_v24  ;;  %v2061_v33 = vpack.c.bf16 %v996_v29, %v995_v28  ;;  %v998_v36 = vld [vmem:[%s3355_s18 + $0x18] sm:$0xff]  ;;  %v1335_v54 = vld [vmem:[%s3356_s16] sm:$0xff]  ;;  %v1336_v55 = vld [vmem:[%s3356_s16 + $0x8] sm:$0xff]  ;;  %s3360_s20 = sld [smem:[#allocation38_spill]]  ;;  %p3361_p2 = scmp.ne.s32.totalorder %s3337_s14, 0 }
 0x13f   : > { %2051 = vmatprep.subr.bf16.mxu1 %v2627_v0  ;;  %v2064_v38 = vpack.c.bf16 %v998_v36, %v997_v35  ;;  %v2079_v56 = vpack.c.bf16 %v1336_v55, %v1335_v54  ;;  %v1337_v57 = vld [vmem:[%s3356_s16 + $0x10] sm:$0xff]  ;;  %v1338_v58 = vld [vmem:[%s3356_s16 + $0x18] sm:$0xff]  ;;  %v1421_v15 = vld [vmem:[%s3357_s2 + $0x8] sm:$0xff] }
 0x140   : > { %2047 = vmatpush3.bf16.msra.mxu0 %v2046_v7  ;;  %v2082_v59 = vpack.c.bf16 %v1338_v58, %v1337_v57  ;;  %v1884_v8 = vld [vmem:[#allocation16] ss:$0 sm:$0xff] }
 0x141   : > { %2054 = vmatprep.subr.bf16.mxu0 %v2627_v0 }
 0x142   : > { %2053 = vmatpush3.bf16.msra.mxu1 %v2052_v26 }
 0x143   : > { %1953 = vmatmul.mubr.msk.f32.vlgmr.msra.gmra.mrb[0].mxu0 %vm753_vm1, %v3100_v13  ;;  %2060 = vmatprep.subr.bf16.mxu1 %v2627_v0 }
 0x144   : > { %2056 = vmatpush3.bf16.msra.mxu0 %v2055_v14  ;;  %1974 = vmatprep.mubr.msk.f32.mxu0 %vm2628_vm0, %v2629_v1  ;;  %v1420_v14 = vld [vmem:[%s3357_s2] sm:$0xff] }
 0x145   : > { %2057 = vmatprep.subr.bf16.mxu0 %v2627_v0  ;;  %v2085_v16 = vpack.c.bf16 %v1421_v15, %v1420_v14 }
 0x148   : > { %2059 = vmatpush3.bf16.msra.mxu0 %v2058_v17  ;;  %v1422_v17 = vld [vmem:[%s3357_s2 + $0x10] sm:$0xff] }
 0x149   : > { %2066 = vmatprep.subr.bf16.mxu0 %v2627_v0 }
 0x14b   : > { %1975 = vmatmul.mubr.msk.f32.vlgmr.msra.gmra.mrb[2].mxu0 %vm753_vm1, %v3100_v13 }
 0x14c   : > { %2068 = vmatpush3.bf16.msra.mxu0 %v2067_v20  ;;  %1996 = vmatprep.mubr.msk.f32.mxu0 %vm2628_vm0, %v2629_v1 }
 0x14d   : > { %2069 = vmatprep.subr.bf16.mxu0 %v2627_v0 }
 0x150   : > { %2071 = vmatpush3.bf16.msra.mxu0 %v2070_v23 }
 0x151   : > { %2010 = vmatprep.subr.mxu0 %v2629_v1 }
 0x153   : > { %1997 = vmatmul.mubr.msk.f32.vlgmr.msra.gmra.mrb[4].mxu0 %vm753_vm1, %v3100_v13 }
 0x154   : > { %2012 = vmatprep.mubr.msk.f32.mxu0 %vm2628_vm0, %v2629_v1 }
 0x216   : > { %v823_v30 = vpop.f32.mrb[0].mxu0 }
 0x217   : > { %v824_v31 = vadd.f32 %v1874_v27, %v823_v30  ;;  %v1954_v32 = vpop.f32.mrb[1].mxu0 }
 0x219   : > { %v827_v34 = vmax.f32 %v824_v31, 0.0  ;;  %v3206_v31 = vld [vmem:[%s735_s8 + $0x8] sm:$0xff] }
 0x21b   : > { %1964 = vmatmul.mubr.msk.f32.vlgmr.msra.gmra.mrb[0].mxu1 %vm753_vm1, %v827_v34 }
 0x21c   : > { %2062 = vmatpush3.bf16.msra.mxu1 %v2061_v33  ;;  %1985 = vmatprep.mubr.msk.f32.mxu1 %vm2628_vm0, %v2629_v1  ;;  %v3208_v33 = vld [vmem:[%s735_s8] sm:$0xff] }
 0x21d   : > { %2063 = vmatprep.subr.bf16.mxu1 %v2627_v0 }
 0x21e   : > { %v990_v41 = vpop.f32.mrb[2].mxu0 }
 0x21f   : > { %v991_v42 = vadd.f32 %v1878_v37, %v990_v41  ;;  %v1976_v43 = vpop.f32.mrb[3].mxu0  ;;  %v3212_v37 = vld [vmem:[%s735_s8 + $0x10] sm:$0xff]  ;;  %s1650_s8 = sshll.u32 %s723_s26, 4  ;;  %s3226_s8 = int_to_ptr.vmem [resolvable:$true] %s1650_s8 }
 0x220   : > { %2065 = vmatpush3.bf16.msra.mxu1 %v2064_v38  ;;  %s2527_s19 = scalar_lea.vmem %s3226_s8, 128 }
 0x221   : > { %v994_v45 = vmax.f32 %v991_v42, 0.0  ;;  %2072 = vmatprep.subr.bf16.mxu1 %v2627_v0  ;;  %p2528_p3 = scmp.ne.s32.totalorder %s3226_s8, %s2527_s19 }
 0x223   : > { %1986 = vmatmul.mubr.msk.f32.vlgmr.msra.gmra.mrb[2].mxu1 %vm753_vm1, %v994_v45  ;;  %p2529_p0 = pnand %p2528_p3, %p3361_p2 }
 0x224   : > { %2074 = vmatpush3.bf16.msra.mxu1 %v2073_v44  ;;  %2007 = vmatprep.mubr.msk.f32.mxu1 %vm2628_vm0, %v2629_v1 }
 0x225   : > { %2075 = vmatprep.subr.bf16.mxu1 %v2627_v0  ;;  %p2530_p6 = pneg %p2529_p0 }
 0x226   : > { %v1157_v50 = vpop.f32.mrb[4].mxu0 }
 0x227   : > { %v1158_v51 = vadd.f32 %v1882_v48, %v1157_v50  ;;  %v1998_v52 = vpop.f32.mrb[5].mxu0 }
 0x228   : > { %2077 = vmatpush3.bf16.msra.mxu1 %v2076_v49 }
 0x229   : > { %v1161_v53 = vmax.f32 %v1158_v51, 0.0  ;;  %2078 = vmatprep.subr.bf16.mxu1 %v2627_v0 }
 0x22b   : > { %2008 = vmatmul.mubr.msk.f32.vlgmr.msra.gmra.mrb[4].mxu1 %vm753_vm1, %v1161_v53 }
 0x22c   : > { %2023 = vmatprep.mubr.msk.f32.mxu1 %vm2628_vm0, %v2629_v1  ;;  %2080 = vmatpush3.bf16.msra.mxu1 %v2079_v56 }
 0x22d   : > { %2081 = vmatprep.subr.bf16.mxu1 %v2627_v0 }
 0x230   : > { %2083 = vmatpush3.bf16.msra.mxu1 %v2082_v59 }
 0x231   : > { %2037 = vmatprep.subr.mxu1 %v2629_v1 }
 0x2ee   : > { %v908_v60 = vpop.f32.mrb[0].mxu1 }
 0x2ef   : > { %v1965_v61 = vpop.f32.mrb[1].mxu1  ;;  %v909_v5 = vadd.f32 %v1876_v63, %v908_v60 }
 0x2f1   : > { %v912_v7 = vmax.f32 %v909_v5, 0.0 }
 0x2f6   : > { %v1075_v2 = vpop.f32.mrb[2].mxu1 }
 0x2f7   : > { %v1076_v3 = vadd.f32 %v1880_v62, %v1075_v2  ;;  %v1987_v4 = vpop.f32.mrb[3].mxu1 }
 0x2f9   : > { %v1079_v6 = vmax.f32 %v1076_v3, 0.0 }
 0x2fb   : > { %2011 = vmatpush3.xpose.msk.msra.mxu0 %vm753_vm1, %v1079_v6 }
 0x2fc   : > { %2084 = vmatprep.subr.bf16.mxu0 %v2627_v0 }
 0x2fe   : > { %v1242_v9 = vpop.f32.mrb[4].mxu1  ;;  %2013 = vmatmul.mubr.msk.f32.vlgmr.msra.gmra.mrb[6].mxu0 %vm753_vm1, %v912_v7 }
 0x2ff   : > { %v1243_v10 = vadd.f32 %v1884_v8, %v1242_v9  ;;  %v2009_v11 = vpop.f32.mrb[5].mxu1  ;;  %2034 = vmatprep.mubr.msk.f32.mxu0 %vm2628_vm0, %v2629_v1  ;;  %2086 = vmatpush3.bf16.msra.mxu0 %v2085_v16 }
 0x300   : > { %2087 = vmatprep.subr.bf16.mxu0 %v2627_v0 }
 0x301   : > { %v1246_v12 = vmax.f32 %v1243_v10, 0.0 }
 0x303   : > { %2024 = vmatmul.mubr.msk.f32.vlgmr.msra.gmra.mrb[6].mxu1 %vm753_vm1, %v1246_v12 }
 0x304   : > { %2039 = vmatprep.mubr.msk.f32.mxu1 %vm2628_vm0, %v2629_v1  ;;  %v1423_v1 = vld [vmem:[%s3357_s2 + $0x18] sm:$0xff] }
 0x305   : > { %v2088_v18 = vpack.c.bf16 %v1423_v1, %v1422_v17 }
 0x307   : > { %2089 = vmatpush3.bf16.msra.mxu0 %v2088_v18 }
 0x3d1   : > { %v1319_v19 = vpop.f32.mrb[6].mxu0 }
 0x3d2   : > { %v2014_v20 = vpop.f32.mrb[7].mxu0  ;;  %v1324_v21 = vsel %vm1323_vm2, %v1319_v19, -inf }
 0x3d3   : > { %1325 = vmax.xlane.f32.xlu0 %v1324_v21 }
 0x3d6   : > { %v1415_v0 = vpop.f32.mrb[6].mxu1 }
 0x3d7   : > { %v1416_v23 = vadd.f32 %v1888_v22, %v1415_v0  ;;  %v2025_v24 = vpop.f32.mrb[7].mxu1 }
 0x3d9   : > { %v1419_v25 = vmax.f32 %v1416_v23, 0.0 }
 0x3db   : > { %2035 = vmatmul.mubr.msk.f32.vlgmr.msra.gmra.mrb[8].mxu0 %vm753_vm1, %v1419_v25 }
 0x460   : > { %v1326_v26 = vpop.xlane.xlu0 %1325 }
 0x461   : > { %v1327_v27 = vsub.f32 %v1319_v19, %v1326_v26 }
 0x463   : > { %v1328_v28 = vmul.f32 1.442695, %v1327_v27 }
 0x465   : > { %2241 = vpow2.f32 %v1328_v28 }
 0x46f   : > { %v2242_v29 = vpop.eup %2241 }
 0x470   : > { %v1330_v30 = vsel %vm1323_vm2, %v2242_v29, 0.0 }
 0x471   : > { %1331 = vadd.xlane.f32.xlu0 %v1330_v30 }
 0x4ae   : > { %v1493_v32 = vpop.f32.mrb[8].mxu0 }
 0x4af   : > { %1506 = vrot.lane.b32.xlu1 %v1493_v32, %s2630_s22  ;;  %v2036_v34 = vpop.f32.mrb[9].mxu0  ;;  %v1503_v35 = vmul.f32 %v3206_v31, %v1493_v32  ;;  %v1502_v36 = vmul.f32 %v3208_v33, %v1493_v32  ;;  %v1504_v38 = vmul.f32 %v3212_v37, %v1493_v32  ;;  %s2634_s22 = smov 96  }
 0x4b1   : > { %1514 = vrot.lane.b32.xlu0 %v1503_v35, %s2631_s4 }
 0x4b3   : > { %1510 = vrot.lane.b32.xlu1 %v1502_v36, %s2632_s0  ;;  %s1897_s0 = sshll.u32 %s2755_s1, 7  ;;  %s1632_s1 = scalar_lea.sflag [#allocation4], %s3036_s7 }
 0x4b4   : > { %s3224_s2 = scalar_lea.hbm %s3360_s20, %s1897_s0 }
 0x4b7   : > { %1518 = vrot.lane.b32.xlu1 %v1504_v38, %s2633_s25 }
 0x4fe   : > { %v1332_v39 = vpop.xlane.xlu0 %1331 }
 0x4ff   : > { %2243 = vrcp.f32 %v1332_v39 }
 0x509   : > { %v2244_v44 = vpop.eup %2243 }
 0x50a   : > { %v1334_v48 = vmul.f32 %v2244_v44, %v2242_v29 }
 0x521   : > { %v1507_v40 = vpop.permute.xlu1 %1506 }
 0x522   : > { %v1521_v41 = vsel %vm753_vm1, %v1246_v12, %v1507_v40 }
 0x523   : > { %v1515_v45 = vpop.permute.xlu0 %1514 }
 0x525   : > { %v1511_v42 = vpop.permute.xlu1 %1510 }
 0x526   : > { %v1523_v43 = vsel %vm1522_vm3, %v1521_v41, %v1511_v42 }
 0x527   : > { %v1525_v46 = vsel %vm1524_vm4, %v1523_v43, %v1515_v45 }
 0x529   : > { %v1519_v47 = vpop.permute.xlu1 %1518 }
 0x52a   : > { %v1527_v49 = vsel %vm1526_vm5, %v1525_v46, %v1519_v47 }
 0x52b   : > { %2038 = vmatpush3.msra.mxu1 %v1527_v49 }
 0x52c   : > { %2040 = vmatmul.mubr.msk.f32.vlgmr.msra.gmra.mrb[8].mxu1 %vm1323_vm2, %v1334_v48 }
 0x5ff   : > { %v1597_v50 = vpop.f32.mrb[8].mxu1 }
 0x600   : > { %v1601_v51 = vadd.f32 %v1597_v50, %v3100_v13  ;;  %1604 = vrot.lane.b32.xlu1 %v1597_v50, %s2634_s22  ;;  %v2041_v52 = vpop.f32.mrb[9].mxu1  ;;  %s2635_s22 = smov [#allocation19]  }
 0x601   : > { %s2531_s5 = sshll.u32 %s2635_s22, 4  ;;  %s2532_s5 = int_to_ptr.vmem [resolvable:$false] %s2531_s5 }
 0x602   : > { %1602 = vst.msk [vmem:[%s723_s26] sm:$0xff] %vm753_vm1, %v1601_v51  ;;  %s2533_s6 = scalar_lea.vmem %s2532_s5, 256  ;;  %p2534_p11 = scmp.lt.s32.totalorder %s3226_s8, %s2532_s5 }
 0x603   : > { %p2535_p12 = scmp.lt.s32.totalorder %s2533_s6, %s2527_s19 }
 0x605   : > { %p2536_p8 = por %p2535_p12, %p2534_p11 }
 0x607   : > { %p2537_p5 = pnand %p2536_p8, %p2530_p6 }
 0x609   : > { %2540 = shalt.err (!%p2537_p5)
}
 0x60a   : > { %s2541_s7 = scalar_lea.hbm %s3224_s2, 128  ;;  %s2545_s4 = scalar_lea.hbm %s3360_s20, 256 }
 0x60b   : > { %p2542_p9 = scmp.ne.s32.totalorder %s3224_s2, %s2541_s7  ;;  %p2546_p4 = scmp.lt.u32.totalorder %s3224_s2, %s3360_s20 }
 0x60c   : > { %p2547_p13 = scmp.lt.u32.totalorder %s2545_s4, %s2541_s7  ;;  %p2549_p3 = scmp.lt.u32.totalorder %s2541_s7, %s3224_s2 }
 0x60d   : > { %p2543_p7 = pnand %p2542_p9, %p3361_p2 }
 0x60e   : > { %p2548_p1 = por %p2547_p13, %p2546_p4 }
 0x60f   : > { %p2544_p10 = pneg %p2543_p7 }
 0x610   : > { %p2550_p0 = por %p2549_p3, %p2548_p1 }
 0x612   : > { %p2551_p6 = pnand %p2550_p0, %p2544_p10 }
 0x614   : > { %2554 = shalt.err (!%p2551_p6)
}
 0x615   : > { %2129 = dma.vmem_to_hbm [thread:$0]  (%p3361_p2), %s3226_s8, 128, %s3224_s2, %s1632_s1   ;;  %vm1613_vm6 = vcmask 31744  }
 0x616   : > { %s2636_s6 = smov 92   ;;  %s2637_s19 = smov 88  }
 0x617   : > { %1609 = vrot.lane.b32.xlu1 %v1597_v50, %s2636_s6  ;;  %s2638_s22 = smov 84   ;;  %s3362_s7 = smul.u32 24, %s3198_s3 }
 0x618   : > { %s3363_s26 = sld [smem:[#allocation39_spill]] }
 0x61b   : > { %1617 = vrot.lane.b32.xlu1 %v1597_v50, %s2637_s19 }
 0x61e   : > { %s740_s4 = scalar_lea.vmem %s3363_s26, %s3362_s7 }
 0x61f   : > { %1625 = vrot.lane.b32.xlu1 %v1597_v50, %s2638_s22 }
 0x672   : > { %v1605_v13 = vpop.permute.xlu1 %1604 }
 0x673   : > { %v1607_v53 = vmul.f32 %v1605_v13, %v3208_v33  ;;  %v1615_v54 = vmul.f32 %v3206_v31, %v1605_v13  ;;  %v1623_v58 = vmul.f32 %v3212_v37, %v1605_v13 }
 0x675   : > { %v1608_v55 = vadd.f32 %v1607_v53, %v3208_v33  ;;  %v1616_v59 = vadd.f32 %v3206_v31, %v1615_v54  ;;  %v1624_v62 = vadd.f32 %v3212_v37, %v1623_v58 }
 0x689   : > { %v1610_v56 = vpop.permute.xlu1 %1609 }
 0x68a   : > { %v1612_v57 = vsub.f32 %v1608_v55, %v1610_v56 }
 0x68c   : > { %1614 = vst.msk [vmem:[%s740_s4] sm:$0xff] %vm1613_vm6, %v1612_v57 }
 0x68d   : > { %v1618_v60 = vpop.permute.xlu1 %1617 }
 0x68e   : > { %v1620_v61 = vsub.f32 %v1616_v59, %v1618_v60 }
 0x690   : > { %1894 = vst.msk [vmem:[%s740_s4 + $0x8] sm:$0xff] %vm1613_vm6, %v1620_v61 }
 0x691   : > { %v1626_v63 = vpop.permute.xlu1 %1625 }
 0x692   : > { %v1628_v2 = vsub.f32 %v1624_v62, %v1626_v63 }
 0x694   : > { %1895 = vst.msk [vmem:[%s740_s4 + $0x10] sm:$0xff] %vm1613_vm6, %v1628_v2 }
 0x695 PF: > { %s1665_s2 = sand.u32 1, %s2601_s27   ;;  %p3364_p2 = scmp.ne.s32.totalorder %s3338_s17, 0 }
 0x696   : > { %p3365_p11 = scmp.ge.s32.totalorder %s2613_s30, 2  ;;  %s1666_s3 = scalar_lea.sflag [#allocation4], %s1665_s2 }
 0x698   : > { %p2164_p12 = pnand %p3365_p11, %p3364_p2 }
 0x69a   : > { %2596 = dma.done.wait (!%p2164_p12), %s1666_s3, 128  }
 0x69b   : > { %2598 = vsyncadd (!%p2164_p12), %s1666_s3, 4294967168  ;;  %p37_p8 = scmp.ge.s32.totalorder %s2966_s24, 4   ;;  %s3366_s27 = smov %s2605_s28 }
 0x69c   : > { %s3367_s28 = smov %s2609_s29  ;;  %s3368_s29 = smov %s2978_s23 }
 0x69d   : > { %s3369_s30 = smov %s2966_s24  ;;  %39 = sbr.rel (!%p37_p8) target bundleno = 24 (0x18), region = 188 }
 0x6a4   :  { %1679 = vsyncpa [#allocation3], 1 }
 0x6a5   :  { %1681 = vsyncpa [#allocation3 + $0x1], 1 }
 0x6a6   :  { %1682 = vsyncpa [#allocation6], 1 }
 0x6a7   :  { %1683 = vsyncpa [#allocation9], 1 }
 0x6a8   :  { %1684 = vsyncpa [#allocation12], 1 }
 0x6a9   :  { %1685 = vsyncpa [#allocation15], 1 }
 0x6aa   :  { %1686 = vsyncpa [#allocation18], 1 }
 0x6ab   :  { %1687 = vsyncpa [#allocation4], 1 }
 0x6ac   :  { %1689 = vsyncpa [#allocation4 + $0x1], 1 }

</bundles_post_ra>
